<compile_context>
chip_gen: v5e
topology: v5e:2x2
jax: 0.10.0
libtpu: 0.0.40
codegen_flags: <defaults>
</compile_context>

<pallas_src>
import jax
import jax.numpy as jnp
from jax.experimental import pallas as pl
from jax.experimental.pallas import tpu as pltpu


# ----------------------------------------------------------------------------
# Kernel
# ----------------------------------------------------------------------------
def _make_kernel(resident_weights):
    def highway_kernel(x_ref, w_ref, b_ref, o_ref):
        """Grid = (batch_tiles, num_layers); one grid step == one layer of one tile.

        x_ref : (TB, D)       input tile (constant index along layer axis)
        w_ref : (L, D, 2D)    resident bf16 fused [flow|gate] weights   (resident mode)
                (1, D, 2D)    streamed bf16 weights for current layer   (streamed mode)
        b_ref : (L, 2D)       f32 fused biases, resident, sublane-packed
        o_ref : (TB, D)       f32 output tile; doubles as the running activation
                              (constant index map along the layer axis -> stays in VMEM)
        """
        layer = pl.program_id(1)

        @pl.when(layer == 0)
        def _():
            o_ref[...] = x_ref[...].astype(jnp.float32)

        x = o_ref[...]                                   # f32 carry
        d = x.shape[-1]

        w = w_ref[layer] if resident_weights else w_ref[0]   # (D, 2D) bf16

        # One fused matmul: columns [0:D) are the flow layer, [D:2D) the gate.
        z = jnp.dot(x.astype(jnp.bfloat16), w,
                    preferred_element_type=jnp.float32)
        z = z + b_ref[pl.ds(layer, 1), :]                # (1, 2D) broadcast add

        flow = jnp.maximum(z[:, :d], 0.0)                # ReLU
        # sigmoid(t) == 0.5*tanh(t/2) + 0.5: single EUP push instead of exp+div.
        gate = 0.5 * jnp.tanh(0.5 * z[:, d:]) + 0.5

        o_ref[...] = x + gate * (flow - x)               # == gate*flow + (1-gate)*x

    return highway_kernel


# ----------------------------------------------------------------------------
# Generation-aware sizing helpers
# ----------------------------------------------------------------------------
def _tpu_vmem_capacity_bytes():
    try:
        info = pltpu.get_tpu_info()
        cap = getattr(info, "vmem_capacity_bytes", None)
        if cap:
            return int(cap)
    except Exception:
        pass
    return 128 << 20  # v5e/v6e default if the query is unavailable


def _weights_fit_resident(d, num_layers, vmem_cap):
    """Can the full bf16 fused weight slab live in VMEM for the whole grid?"""
    w_bytes = num_layers * d * (2 * d) * 2
    # ~35% of physical VMEM for the (possibly double-buffered) slab leaves room
    # for io tiles / bias / intermediates / compiler scratch:
    #   ~22 MiB on v7x (64 MiB), ~45 MiB on v5e/v6e (128 MiB).
    return w_bytes <= int(0.35 * vmem_cap)


def _pick_batch_tile(batch, *, resident_w, small_vmem):
    if small_vmem or resident_w:
        cands = (512, 256, 128, 64, 32, 16, 8)
    else:
        # Streamed weights on big-VMEM chips (v6e): TB >= ~650 is needed to
        # hide the per-layer 4*D^2-byte weight stream behind the MXU.
        cands = (1024, 768, 512, 256, 128, 64, 32, 16, 8)
    if small_vmem:
        # v7x has 2 TensorCores: prefer >= 2 batch tiles so the "parallel"
        # batch axis can be sharded across cores.
        for tb in cands:
            if batch % tb == 0 and batch // tb >= 2:
                return tb
    for tb in cands:
        if batch % tb == 0:
            return tb
    return batch  # small / unaligned batch: single full-extent tile


def _vmem_limit_bytes(tb, d, num_layers, *, resident_w, vmem_cap):
    w_slab = num_layers * d * (2 * d) * 2    # bf16 fused weights, all layers
    w_blk = d * (2 * d) * 2                  # one layer's bf16 weight block
    io_blk = tb * d * 4                      # f32 x / out tiles
    b_slab = num_layers * (2 * d) * 4        # f32 bias slab (sublane-packed)
    tmp = 6 * tb * (2 * d) * 4               # f32 z/flow/gate intermediates + headroom
    w_need = 2 * w_slab if resident_w else 3 * w_blk
    need = w_need + 4 * io_blk + 2 * b_slab + tmp + (2 << 20)
    if vmem_cap < (100 << 20):               # v7x-class: leave headroom under 64 MiB
        cap = int(0.75 * vmem_cap)
    else:                                    # v5e/v6e: allow well past 64 MiB
        cap = min(int(0.80 * vmem_cap), 100 << 20)
    return int(min(max(need, 8 << 20), cap))


# ----------------------------------------------------------------------------
# Wrapper
# ----------------------------------------------------------------------------
def highway_forward(x, w_cat, b_cat, *, batch_tile=None):
    """x: (B, D); w_cat: (L, D, 2D) [flow|gate]; b_cat: (L, 2D). Returns (B, D) f32."""
    B, D = x.shape
    L = w_cat.shape[0]
    assert w_cat.shape == (L, D, 2 * D)
    assert b_cat.shape == (L, 2 * D)
    assert D % 128 == 0, "pad the feature dim to a multiple of 128 (lane width)"

    x = x.astype(jnp.float32)
    w_cat = w_cat.astype(jnp.bfloat16)       # weights stream/reside in bf16 (MXU input)
    b_cat = b_cat.astype(jnp.float32)

    vmem_cap = _tpu_vmem_capacity_bytes()
    small_vmem = vmem_cap < (100 << 20)
    resident_w = _weights_fit_resident(D, L, vmem_cap)

    tb = (batch_tile if batch_tile is not None
          else _pick_batch_tile(B, resident_w=resident_w, small_vmem=small_vmem))
    assert B % tb == 0

    if resident_w:
        # Full slab, constant index map -> fetched once, resident across the grid.
        w_spec = pl.BlockSpec((L, D, 2 * D), lambda b, l: (0, 0, 0))
    elif small_vmem:
        w_spec = pl.BlockSpec((1, D, 2 * D), lambda b, l: (l, 0, 0))
    else:
        # Streamed per-layer weights on big-VMEM chips: a third buffer hides
        # the L-1 -> 0 index jump at each batch-tile boundary.
        w_spec = pl.BlockSpec((1, D, 2 * D), lambda b, l: (l, 0, 0),
                              pipeline_mode=pl.Buffered(3))

    return pl.pallas_call(
        _make_kernel(resident_w),
        out_shape=jax.ShapeDtypeStruct((B, D), jnp.float32),
        grid_spec=pltpu.PrefetchScalarGridSpec(
            num_scalar_prefetch=0,
            grid=(B // tb, L),                                   # layer axis last
            in_specs=[
                pl.BlockSpec((tb, D), lambda b, l: (b, 0)),      # x tile
                w_spec,                                          # fused weights
                pl.BlockSpec((L, 2 * D), lambda b, l: (0, 0)),   # resident bias slab
            ],
            out_specs=pl.BlockSpec((tb, D), lambda b, l: (b, 0)),
        ),
        compiler_params=pltpu.CompilerParams(
            dimension_semantics=("parallel", "arbitrary"),
            vmem_limit_bytes=_vmem_limit_bytes(
                tb, D, L, resident_w=resident_w, vmem_cap=vmem_cap),
        ),
    )(x, w_cat, b_cat)


# ----------------------------------------------------------------------------
# Params / reference
# ----------------------------------------------------------------------------
def init_params(key, input_dim, num_layers):
    """PyTorch-Linear-style init U(-1/sqrt(D), 1/sqrt(D)); fused + pre-transposed."""
    d = input_dim
    bound = 1.0 / jnp.sqrt(jnp.float32(d))
    keys = jax.random.split(key, 4)
    # Stored as (L, in, out) == transpose of PyTorch's (out, in) so kernel does x @ W.
    wf = jax.random.uniform(keys[0], (num_layers, d, d), jnp.float32, -bound, bound)
    bf = jax.random.uniform(keys[1], (num_layers, d), jnp.float32, -bound, bound)
    wg = jax.random.uniform(keys[2], (num_layers, d, d), jnp.float32, -bound, bound)
    bg = jax.random.uniform(keys[3], (num_layers, d), jnp.float32, -bound, bound)
    w_cat = jnp.concatenate([wf, wg], axis=-1).astype(jnp.bfloat16)   # (L, D, 2D)
    b_cat = jnp.concatenate([bf, bg], axis=-1)                        # (L, 2D) f32
    return w_cat, b_cat


def highway_reference(x, w_cat, b_cat, compute_dtype=jnp.bfloat16):
    """Plain-JAX reference mirroring the PyTorch forward (fused weights)."""
    d = x.shape[-1]
    x = x.astype(jnp.float32)
    for i in range(w_cat.shape[0]):
        z = jnp.dot(x.astype(compute_dtype), w_cat[i].astype(compute_dtype),
                    preferred_element_type=jnp.float32) + b_cat[i]
        flow = jax.nn.relu(z[:, :d])
        gate = jax.nn.sigmoid(z[:, d:])
        x = gate * flow + (1.0 - gate) * x
    return x


if __name__ == "__main__":
    batch, input_dim, num_layers = 16, 128, 2   # lane-dense small demo (D % 128 == 0)

    key = jax.random.PRNGKey(0)
    k_x, k_p = jax.random.split(key)
    x = jax.random.normal(k_x, (batch, input_dim), jnp.float32)
    w_cat, b_cat = init_params(k_p, input_dim, num_layers)

    out = jax.block_until_ready(highway_forward(x, w_cat, b_cat))
    assert out.shape == (batch, input_dim)

    # Matched-precision reference (bf16 weight streaming, f32 carry) -- tight check.
    ref = highway_reference(x, w_cat, b_cat, compute_dtype=jnp.bfloat16)
    assert jnp.allclose(out, ref, atol=2e-3, rtol=2e-3), "mismatch vs bf16 reference"

    # Full-f32 math (PyTorch module semantics) -- loose check on bf16 quantization.
    ref32 = highway_reference(x, w_cat, b_cat, compute_dtype=jnp.float32)
    assert jnp.allclose(out, ref32, atol=5e-2, rtol=5e-2), "mismatch vs f32 reference"

    print("KERNEL_OK")
</pallas_src>

<mosaic_0001>
module attributes {stable_mosaic.version = 11 : i64} {
  func.func @highway_kernel(%arg0: i32, %arg1: i32, %arg2: memref<16x128xf32, #tpu.memory_space<vmem>>, %arg3: memref<2x128x256xbf16, #tpu.memory_space<vmem>>, %arg4: memref<2x256xf32, #tpu.memory_space<vmem>>, %arg5: memref<16x128xf32, #tpu.memory_space<vmem>>) attributes {dimension_semantics = [#tpu.dimension_semantics<parallel>, #tpu.dimension_semantics<arbitrary>], iteration_bounds = array<i64: 1, 2>, scalar_prefetch = 0 : i64, scratch_operands = 0 : i64, tpu.core_type = #tpu.core_type<tc>, window_params = [{transform_indices = @transform_0, window_bounds = array<i64: 16, 128>}, {pipeline_mode = #tpu.pipeline_mode<synchronous>, transform_indices = @transform_1, window_bounds = array<i64: 2, 128, 256>}, {pipeline_mode = #tpu.pipeline_mode<synchronous>, transform_indices = @transform_2, window_bounds = array<i64: 2, 256>}, {transform_indices = @transform_3, window_bounds = array<i64: 16, 128>}]} {
    %c0_i32 = arith.constant 0 : i32
    %0 = arith.cmpi eq, %arg1, %c0_i32 : i32
    %1 = arith.extui %0 : i1 to i32
    %c0_i32_0 = arith.constant 0 : i32
    %2 = arith.cmpi ne, %1, %c0_i32_0 : i32
    scf.if %2 {
      %c0_11 = arith.constant 0 : index
      %c0_12 = arith.constant 0 : index
      %28 = vector.load %arg2[%c0_11, %c0_12] : memref<16x128xf32, #tpu.memory_space<vmem>>, vector<16x128xf32>
      %c0_13 = arith.constant 0 : index
      %c0_14 = arith.constant 0 : index
      %29 = vector.load %arg5[%c0_13, %c0_14] : memref<16x128xf32, #tpu.memory_space<vmem>>, vector<16x128xf32>
      tpu.vector_store %arg5[%c0_13, %c0_14], %28 {strides = array<i32>} : memref<16x128xf32, #tpu.memory_space<vmem>>, vector<16x128xf32>,
    } else {
    }
    %c0 = arith.constant 0 : index
    %c0_1 = arith.constant 0 : index
    %3 = vector.load %arg5[%c0, %c0_1] : memref<16x128xf32, #tpu.memory_space<vmem>>, vector<16x128xf32>
    %4 = arith.index_cast %arg1 : i32 to index
    %c0_2 = arith.constant 0 : index
    %c0_3 = arith.constant 0 : index
    %5 = vector.load %arg3[%4, %c0_2, %c0_3] : memref<2x128x256xbf16, #tpu.memory_space<vmem>>, vector<1x128x256xbf16>
    %6 = vector.shape_cast %5 : vector<1x128x256xbf16> to vector<128x256xbf16>
    %7 = arith.truncf %3 : vector<16x128xf32> to vector<16x128xbf16>
    %cst = arith.constant dense<0.000000e+00> : vector<16x256xf32>
    %8 = tpu.matmul %7, %6, %cst {dimension_numbers = #tpu.dot_dimension_numbers<[1], [0], [0], [1], [0, 0, 1, 1], [], []>} : vector<16x128xbf16>, vector<128x256xbf16>, vector<16x256xf32> -> vector<16x256xf32>
    %9 = arith.index_cast %arg1 : i32 to index
    %c0_4 = arith.constant 0 : index
    %10 = vector.load %arg4[%9, %c0_4] : memref<2x256xf32, #tpu.memory_space<vmem>>, vector<1x256xf32>
    %11 = vector.broadcast %10 : vector<1x256xf32> to vector<16x256xf32>
    %12 = arith.addf %8, %11 : vector<16x256xf32>
    %13 = vector.extract_strided_slice %12 {offsets = [0, 0], sizes = [16, 128], strides = [1, 1]} : vector<16x256xf32> to vector<16x128xf32>
    %cst_5 = arith.constant 0.000000e+00 : f32
    %14 = vector.broadcast %cst_5 : f32 to vector<16x128xf32>
    %15 = arith.maximumf %13, %14 : vector<16x128xf32>
    %16 = vector.extract_strided_slice %12 {offsets = [0, 128], sizes = [16, 128], strides = [1, 1]} : vector<16x256xf32> to vector<16x128xf32>
    %cst_6 = arith.constant 5.000000e-01 : f32
    %17 = vector.broadcast %cst_6 : f32 to vector<16x128xf32>
    %18 = arith.mulf %17, %16 : vector<16x128xf32>
    %19 = math.tanh %18 : vector<16x128xf32>
    %cst_7 = arith.constant 5.000000e-01 : f32
    %20 = vector.broadcast %cst_7 : f32 to vector<16x128xf32>
    %21 = arith.mulf %20, %19 : vector<16x128xf32>
    %cst_8 = arith.constant 5.000000e-01 : f32
    %22 = vector.broadcast %cst_8 : f32 to vector<16x128xf32>
    %23 = arith.addf %21, %22 : vector<16x128xf32>
    %24 = arith.subf %15, %3 : vector<16x128xf32>
    %25 = arith.mulf %23, %24 : vector<16x128xf32>
    %26 = arith.addf %3, %25 : vector<16x128xf32>
    %c0_9 = arith.constant 0 : index
    %c0_10 = arith.constant 0 : index
    %27 = vector.load %arg5[%c0_9, %c0_10] : memref<16x128xf32, #tpu.memory_space<vmem>>, vector<16x128xf32>
    tpu.vector_store %arg5[%c0_9, %c0_10], %26 {strides = array<i32>} : memref<16x128xf32, #tpu.memory_space<vmem>>, vector<16x128xf32>,
    return
  }
  func.func @transform_0(%arg0: i32, %arg1: i32) -> (i32, i32) {
    %c0_i32 = arith.constant 0 : i32
    %c0_i32_0 = arith.constant 0 : i32
    return %arg0, %c0_i32 : i32, i32
  }
  func.func @transform_1(%arg0: i32, %arg1: i32) -> (i32, i32, i32) {
    %c0_i32 = arith.constant 0 : i32
    %c0_i32_0 = arith.constant 0 : i32
    %c0_i32_1 = arith.constant 0 : i32
    %c0_i32_2 = arith.constant 0 : i32
    return %c0_i32, %c0_i32_0, %c0_i32_1 : i32, i32, i32
  }
  func.func @transform_2(%arg0: i32, %arg1: i32) -> (i32, i32) {
    %c0_i32 = arith.constant 0 : i32
    %c0_i32_0 = arith.constant 0 : i32
    %c0_i32_1 = arith.constant 0 : i32
    return %c0_i32, %c0_i32_0 : i32, i32
  }
  func.func @transform_3(%arg0: i32, %arg1: i32) -> (i32, i32) {
    %c0_i32 = arith.constant 0 : i32
    %c0_i32_0 = arith.constant 0 : i32
    return %arg0, %c0_i32 : i32, i32
  }
}

</mosaic_0001>

<bundles_post_ra>
// kernel: tpu_custom_call.1
= control target key start
LH: loop header
LB: loop body
LE: loop exit
PB: predicated region body
PF: predicated region fallthrough
CT: control target
= control target key end

     0   :  { %8 = vsyncpa [#allocation3], 0  ;;  %s940_s0 = inlined_call_operand.hbm [shape: f32[16,128], index: 0, kind: input, shape index: {}]   ;;  %s941_s1 = inlined_call_operand.hbm [shape: bf16[2,128,256], index: 1, kind: input, shape index: {}]   ;;  %s942_s2 = inlined_call_operand.hbm [shape: f32[2,256], index: 2, kind: input, shape index: {}]   ;;  %s943_s3 = inlined_call_operand.hbm [shape: f32[16,128], index: 3, kind: output, shape index: {}]  }
   0x1   :  { %9 = vsyncpa [#allocation6], 0 }
   0x2   :  { %10 = vsyncpa [#allocation4], 0  ;;  %s824_s12 = smov 0   ;;  %s826_s13 = smov 0  }
   0x3   :  { %s828_s14 = smov 0  }
   0x4 LB: > { %s472_s15 = sadd.s32 4294967295, %s794_s14   ;;  %p473_p0 = scmp.ge.s32.totalorder %s794_s14, 1  ;;  %s794_s14 = sphi %s828_s14, %s16_s14   ;;  %s790_s13 = sphi %s826_s13, %s948_s13   ;;  %s786_s12 = sphi %s824_s12, %s947_s12  }
   0x5   : > { %p127_p1 = scmp.lt.s32.totalorder %s794_s14, 3  ;;  %p844_p2 = scmp.eq.s32.totalorder %s472_s15, 0 }
   0x6   : > { %s155_s19 = sshll.u32 %s941_s1, 4  ;;  %s796_s21 = smov [#allocation5]   ;;  %s156_s19 = int_to_ptr.hbm [resolvable:$true] %s155_s19 }
   0x7   : > { %p851_p3 = pnand %p473_p0, %p127_p1  ;;  %s157_s22 = sshll.u32 %s796_s21, 4  ;;  %s158_s22 = int_to_ptr.vmem [resolvable:$true] %s157_s22 }
   0x8   : > { %s25_s24 = sadd.s32 1, %s790_s13  ;;  %s797_s25 = smov 128  }
   0x9   : > { %p588_p4 = pneg %p851_p3  ;;  %p26_p6 = scmp.ge.s32.totalorder %s25_s24, 2 }
   0xa   : > { %s798_s26 = smov 8   ;;  %s141_s29 = sshll.u32 %s940_s0, 4  ;;  %s142_s29 = int_to_ptr.hbm [resolvable:$true] %s141_s29 }
   0xb   : > { %p859_p5 = pnand %p844_p2, %p588_p4  ;;  %s950_s24 = smov (%p26_p6, %s25_s24), 0 }
   0xc   : > { %s799_s30 = smov [#allocation2]   ;;  %s170_s7 = sshll.u32 %s942_s2, 4  ;;  %s171_s7 = int_to_ptr.hbm [resolvable:$true] %s170_s7 }
   0xd   : > { %594 = dma.hbm_to_vmem [thread:$0]  (!%p859_p5), %s156_s19, 4096, %s158_s22, [#allocation6], %s797_s25, %s797_s25, %s798_s26  }
   0xe   : > { %s143_s4 = sshll.u32 %s799_s30, 4  ;;  %s800_s8 = smov [#allocation7]   ;;  %s144_s4 = int_to_ptr.vmem [resolvable:$true] %s143_s4 }
   0xf   : > { %591 = dma.hbm_to_vmem [thread:$0]  (!%p859_p5), %s142_s29, 256, %s144_s4, [#allocation3], %s797_s25, %s797_s25, %s798_s26  }
  0x10   : > { %s172_s9 = sshll.u32 %s800_s8, 4  ;;  %185 = sbr.rel (%p851_p3) target bundleno = 227 (0xe3), region = 32  ;;  %s173_s9 = int_to_ptr.vmem [resolvable:$true] %s172_s9 }
  0x11   : > { %597 = dma.hbm_to_vmem [thread:$0]  (!%p859_p5), %s171_s7, 64, %s173_s9, [#allocation6]  }
  0x15   : > { %773 = dma.done.wait (%p844_p2), [#allocation3], 256  }
  0x16   : > { %775 = vsyncadd (%p844_p2), [#allocation3], 4294967040 }
  0x17   : > { %777 = dma.done.wait (%p844_p2), [#allocation6], 4160  }
  0x18   : > { %779 = vsyncadd (%p844_p2), [#allocation6], 4294963136  ;;  %p481_p7 = scmp.ne.s32.totalorder %s786_s12, 0 }
  0x1a   : > { %215 = sbr.rel (%p481_p7) target bundleno = 34 (0x22), region = 48 }
  0x1f   : > { %v216_v0 = vld [vmem:[#allocation2] sm:$0xff]  ;;  %v217_v1 = vld [vmem:[#allocation2 + $0x8] sm:$0xff] }
  0x20   : > { %218 = vst [vmem:[#allocation8] sm:$0xff] %v216_v0 }
  0x21   : > { %219 = vst [vmem:[#allocation8 + $0x8] sm:$0xff] %v217_v1 }
  0x22 PF: > { %s554_s10 = sshll.u32 %s786_s12, 7  ;;  %s242_s16 = sshra.s32 %s786_s12, 1 }
  0x23   : > { %s890_s11 = scalar_lea.vmem [#allocation5], %s554_s10  ;;  %s245_s17 = sand.u32 1, %s786_s12 }
  0x24   : > { %v569_v2 = vld [vmem:[%s890_s11 + $0x74] sm:$0xf]  ;;  %v546_v3 = vld [vmem:[%s890_s11 + $0x78] sm:$0xf0]  ;;  %v544_v4 = vld [vmem:[%s890_s11 + $0x70] sm:$0xf] }
  0x25   : > { %v549_v5 = vor.u32 %v569_v2, %v546_v3  ;;  %v570_v6 = vld [vmem:[%s890_s11 + $0x74] sm:$0xf0]  ;;  %v567_v7 = vld [vmem:[%s890_s11 + $0x64] sm:$0xf]  ;;  %v538_v8 = vld [vmem:[%s890_s11 + $0x68] sm:$0xf0] }
  0x26   : > { %v545_v9 = vor.u32 %v570_v6, %v544_v4  ;;  %v536_v10 = vld [vmem:[%s890_s11 + $0x60] sm:$0xf]  ;;  %v568_v11 = vld [vmem:[%s890_s11 + $0x64] sm:$0xf0]  ;;  %v541_v12 = vor.u32 %v567_v7, %v538_v8  ;;  %v565_v14 = vld [vmem:[%s890_s11 + $0x54] sm:$0xf] }
  0x27   : > { %350 = vmatpush.bf16.msra.mxu1 %v549_v5  ;;  %v537_v13 = vor.u32 %v568_v11, %v536_v10  ;;  %v530_v15 = vld [vmem:[%s890_s11 + $0x58] sm:$0xf0]  ;;  %v528_v16 = vld [vmem:[%s890_s11 + $0x50] sm:$0xf]  ;;  %v566_v17 = vld [vmem:[%s890_s11 + $0x54] sm:$0xf0] }
  0x28   : > { %336 = vmatpush.bf16.msra.mxu0 %v545_v9  ;;  %v533_v18 = vor.u32 %v565_v14, %v530_v15  ;;  %v529_v19 = vor.u32 %v566_v17, %v528_v16  ;;  %v563_v20 = vld [vmem:[%s890_s11 + $0x44] sm:$0xf]  ;;  %v522_v21 = vld [vmem:[%s890_s11 + $0x48] sm:$0xf0]  ;;  %v520_v22 = vld [vmem:[%s890_s11 + $0x40] sm:$0xf] }
  0x29   : > { %v564_v23 = vld [vmem:[%s890_s11 + $0x44] sm:$0xf0]  ;;  %v525_v24 = vor.u32 %v563_v20, %v522_v21  ;;  %v561_v26 = vld [vmem:[%s890_s11 + $0x34] sm:$0xf]  ;;  %v514_v27 = vld [vmem:[%s890_s11 + $0x38] sm:$0xf0] }
  0x2a   : > { %v521_v25 = vor.u32 %v564_v23, %v520_v22  ;;  %v512_v28 = vld [vmem:[%s890_s11 + $0x30] sm:$0xf]  ;;  %v562_v29 = vld [vmem:[%s890_s11 + $0x34] sm:$0xf0]  ;;  %v517_v30 = vor.u32 %v561_v26, %v514_v27  ;;  %v559_v32 = vld [vmem:[%s890_s11 + $0x24] sm:$0xf] }
  0x2b   : > { %351 = vmatpush.bf16.msra.mxu1 %v541_v12  ;;  %v513_v31 = vor.u32 %v562_v29, %v512_v28  ;;  %v506_v33 = vld [vmem:[%s890_s11 + $0x28] sm:$0xf0]  ;;  %v504_v34 = vld [vmem:[%s890_s11 + $0x20] sm:$0xf]  ;;  %v560_v35 = vld [vmem:[%s890_s11 + $0x24] sm:$0xf0] }
  0x2c   : > { %337 = vmatpush.bf16.msra.mxu0 %v537_v13  ;;  %v509_v36 = vor.u32 %v559_v32, %v506_v33  ;;  %v505_v37 = vor.u32 %v560_v35, %v504_v34  ;;  %v557_v38 = vld [vmem:[%s890_s11 + $0x14] sm:$0xf]  ;;  %v498_v39 = vld [vmem:[%s890_s11 + $0x18] sm:$0xf0]  ;;  %v496_v40 = vld [vmem:[%s890_s11 + $0x10] sm:$0xf] }
  0x2d   : > { %v558_v41 = vld [vmem:[%s890_s11 + $0x14] sm:$0xf0]  ;;  %v501_v42 = vor.u32 %v557_v38, %v498_v39  ;;  %v555_v44 = vld [vmem:[%s890_s11 + $0x4] sm:$0xf]  ;;  %v490_v45 = vld [vmem:[%s890_s11 + $0x8] sm:$0xf0] }
  0x2e   : > { %v497_v43 = vor.u32 %v558_v41, %v496_v40  ;;  %v488_v46 = vld [vmem:[%s890_s11] sm:$0xf]  ;;  %v556_v47 = vld [vmem:[%s890_s11 + $0x4] sm:$0xf0]  ;;  %v493_v48 = vor.u32 %v555_v44, %v490_v45  ;;  %v220_v49 = vld [vmem:[#allocation8] sm:$0xff]  ;;  %s571_s18 = sshll.u32 %s242_s16, 2 }
  0x2f   : > { %352 = vmatpush.bf16.msra.mxu1 %v533_v18  ;;  %v221_v50 = vld [vmem:[#allocation8 + $0x8] sm:$0xff]  ;;  %v489_v51 = vor.u32 %v556_v47, %v488_v46  ;;  %s248_s19 = sadd.s32 %s571_s18, %s245_s17  ;;  %s801_s12 = smov [#allocation8]  }
  0x30   : > { %338 = vmatpush.bf16.msra.mxu0 %v529_v19  ;;  %v241_v52 = vpack.c.bf16 %v221_v50, %v220_v49  ;;  %s249_s20 = scalar_lea.vmem [#allocation7], %s248_s19  ;;  %s390_s21 = sshll.u32 %s801_s12, 4  ;;  %s391_s21 = int_to_ptr.vmem [resolvable:$true] %s390_s21 }
  0x31   : > { %v250_v53 = vld [vmem:[%s249_s20] ss:$2 sm:$0x3]  ;;  %s392_s25 = sshll.u32 %s943_s3, 4  ;;  %p604_p8 = scmp.eq.s32.totalorder %s472_s15, 1  ;;  %s393_s25 = int_to_ptr.hbm [resolvable:$true] %s392_s25 }
  0x32   : > { %v253_v54 = vperm.slane %v250_v53, 1  ;;  %v252_v56 = vperm.slane %v250_v53, 0  ;;  %s802_s26 = smov 128   ;;  %s803_s27 = smov 8  }
  0x33   : > { %353 = vmatpush.bf16.msra.mxu1 %v525_v24 }
  0x34   : > { %339 = vmatpush.bf16.msra.mxu0 %v521_v25 }
  0x37   : > { %354 = vmatpush.bf16.msra.mxu1 %v517_v30 }
  0x38   : > { %340 = vmatpush.bf16.msra.mxu0 %v513_v31 }
  0x3b   : > { %355 = vmatpush.bf16.msra.mxu1 %v509_v36 }
  0x3c   : > { %341 = vmatpush.bf16.msra.mxu0 %v505_v37 }
  0x3f   : > { %356 = vmatpush.bf16.msra.mxu1 %v501_v42 }
  0x40   : > { %342 = vmatpush.bf16.msra.mxu0 %v497_v43 }
  0x43   : > { %357 = vmatpush.bf16.msra.mxu1 %v493_v48 }
  0x44   : > { %343 = vmatpush.bf16.msra.mxu0 %v489_v51 }
  0x46   : > { %358 = vmatmul.bf16.vlgmr.msra.gmra.mxu1 %v241_v52 }
  0x47   : > { %344 = vmatmul.bf16.vlgmr.msra.gmra.mxu0 %v241_v52 }
  0xc3   : > { %v359_v55 = vpop.f32.mrf.mxu1 }
  0xc4   : > { %v360_v57 = vadd.f32 %v359_v55, %v253_v54  ;;  %v345_v58 = vpop.f32.mrf.mxu0 }
  0xc5   : > { %v346_v60 = vadd.f32 %v345_v58, %v252_v56 }
  0xc6   : > { %v366_v59 = vmul.f32 0.5, %v360_v57 }
  0xc7   : > { %v364_v61 = vmax.f32 %v346_v60, 0.0 }
  0xc8   : > { %638 = vtanh.f32 %v366_v59 }
  0xc9   : > { %v374_v4 = vsub.f32 %v364_v61, %v220_v49 }
  0xcb   : > { %v361_v62 = vpop.f32.mrf.mxu1 }
  0xcc   : > { %v362_v63 = vadd.f32 %v361_v62, %v253_v54  ;;  %v347_v2 = vpop.f32.mrf.mxu0 }
  0xcd   : > { %v348_v6 = vadd.f32 %v347_v2, %v252_v56 }
  0xce   : > { %v639_v0 = vpop.eup %638  ;;  %v367_v1 = vmul.f32 0.5, %v362_v63 }
  0xcf   : > { %v370_v3 = vmul.f32 0.5, %v639_v0  ;;  %v365_v9 = vmax.f32 %v348_v6, 0.0 }
  0xd0   : > { %640 = vtanh.f32 %v367_v1 }
  0xd1   : > { %v372_v5 = vadd.f32 0.5, %v370_v3  ;;  %v375_v13 = vsub.f32 %v365_v9, %v221_v50 }
  0xd3   : > { %v376_v7 = vmul.f32 %v374_v4, %v372_v5 }
  0xd5   : > { %v378_v8 = vadd.f32 %v376_v7, %v220_v49 }
  0xd6   : > { %v641_v10 = vpop.eup %640 }
  0xd7   : > { %380 = vst [vmem:[#allocation8] sm:$0xff] %v378_v8  ;;  %v371_v11 = vmul.f32 0.5, %v641_v10 }
  0xd9   : > { %v373_v12 = vadd.f32 0.5, %v371_v11 }
  0xdb   : > { %v377_v14 = vmul.f32 %v375_v13, %v373_v12 }
  0xdd   : > { %v379_v15 = vadd.f32 %v377_v14, %v221_v50 }
  0xdf   : > { %381 = vst [vmem:[#allocation8 + $0x8] sm:$0xff] %v379_v15 }
  0xe0   : > { %585 = dma.vmem_to_hbm [thread:$0]  (%p604_p8), %s391_s21, 256, %s393_s25, [#allocation4], %s802_s26, %s802_s26, %s803_s27  }
  0xe1   : > { %781 = dma.done.wait (%p604_p8), [#allocation4], 256  }
  0xe2   : > { %783 = vsyncadd (%p604_p8), [#allocation4], 4294967040 }
  0xe3 PF: > { %s16_s14 = sadd.s32 1, %s794_s14   ;;  %s947_s12 = smov %s790_s13 }
  0xe4   : > { %p13_p9 = scmp.ge.s32.totalorder %s16_s14, 4   ;;  %s948_s13 = smov %s950_s24 }
  0xe6   :  { %15 = sbr.rel (!%p13_p9) target bundleno = 4 (0x4), region = 77 }
  0xeb   :  { %409 = vsyncpa [#allocation3], 1 }
  0xec   :  { %411 = vsyncpa [#allocation3 + $0x1], 1 }
  0xed   :  { %412 = vsyncpa [#allocation6], 1 }
  0xee   :  { %413 = vsyncpa [#allocation4], 1 }
  0xef   :  { %415 = vsyncpa [#allocation4 + $0x1], 1 }

</bundles_post_ra>
